<compile_context>
chip_gen: v6e
topology: v6e:2x2x1
jax: 0.10.0
libtpu: 0.0.40
codegen_flags: <defaults>
</compile_context>

<pallas_src>
import functools

import numpy as np
import jax
import jax.numpy as jnp
from jax.experimental import pallas as pl
from jax.experimental.pallas import tpu as pltpu

# small shapes consistent with the surrounding DLinear-style model
B = 2        # batch
S = 16       # seq_len
C = 4        # n_features / channels
KER = 5      # kernel_size
STRIDE = 1   # stride


@functools.lru_cache(maxsize=None)
def _avg_matrix_np(seq_len, ker, stride):
    """(L_out, seq_len) operator equivalent to replicate-pad + AvgPool1d.

    Front/end replicate padding of (ker-1)//2 rows is folded into the first /
    last columns of the averaging matrix, so the kernel needs no concat and no
    shifted sublane slices.  Cached: built once per configuration.
    """
    pad = (ker - 1) // 2
    padded = seq_len + 2 * pad
    l_out = (padded - ker) // stride + 1
    a = np.zeros((l_out, seq_len), np.float32)
    for l in range(l_out):
        for j in range(ker):
            p = l * stride + j                       # index into padded sequence
            s = min(max(p - pad, 0), seq_len - 1)    # replicate-pad clamp
            a[l, s] += 1.0 / ker
    return a


def moving_avg_kernel(a_ref, x_ref, o_ref):
    """out = A @ x2d  -- one MXU matmul for the whole batch.

    a_ref: (L_out, S)   banded averaging operator
    x_ref: (S, B*C)     batch folded into the lane axis
    o_ref: (L_out, B*C)
    """
    o_ref[...] = jnp.dot(
        a_ref[...], x_ref[...], preferred_element_type=jnp.float32
    ).astype(o_ref.dtype)


@functools.partial(jax.jit, static_argnames=("ker", "stride"))
def moving_avg_forward(x, ker, stride):
    bb, ss, cc = x.shape
    a = jnp.asarray(_avg_matrix_np(ss, ker, stride), dtype=x.dtype)
    l_out = a.shape[0]

    # Layout plumbing (inside the jit, fused by XLA): (B, S, C) -> (S, B*C)
    # so the whole batch is a single matmul in the kernel.
    x2d = jnp.transpose(x, (1, 0, 2)).reshape(ss, bb * cc)

    vmem = pl.BlockSpec(memory_space=pltpu.MemorySpace.VMEM)
    itemsize = jnp.dtype(x.dtype).itemsize
    cost = pl.CostEstimate(
        flops=2 * bb * l_out * ss * cc,
        bytes_accessed=(a.size + x.size + bb * l_out * cc) * itemsize,
        transcendentals=0,
    )

    y2d = pl.pallas_call(
        moving_avg_kernel,
        in_specs=[vmem, vmem],
        out_specs=vmem,
        out_shape=jax.ShapeDtypeStruct((l_out, bb * cc), x.dtype),
        cost_estimate=cost,
    )(a, x2d)

    # (L_out, B*C) -> (B, L_out, C)
    return jnp.transpose(y2d.reshape(l_out, bb, cc), (1, 0, 2))


# ------------------------------ pure-JAX reference -----------------------------
def reference_moving_avg(x, ker, stride):
    """Direct transcription of the PyTorch forward (repeat/cat/AvgPool1d)."""
    pad = (ker - 1) // 2
    front = jnp.repeat(x[:, :1, :], pad, axis=1)
    end = jnp.repeat(x[:, -1:, :], pad, axis=1)
    xp = jnp.concatenate([front, x, end], axis=1)
    l_out = (xp.shape[1] - ker) // stride + 1
    win = jnp.stack(
        [xp[:, l * stride:l * stride + ker, :] for l in range(l_out)], axis=1
    )
    return win.mean(axis=2)


if __name__ == "__main__":
    key = jax.random.PRNGKey(0)
    x = jax.random.normal(key, (B, S, C), jnp.float32)

    # primary config (odd kernel) plus an even kernel size to show the
    # replicate-pad fold is general (even ker just gives L_out = S - 1).
    for ker, stride in ((KER, STRIDE), (10, 1)):
        y = jax.block_until_ready(moving_avg_forward(x, ker, stride))
        y_ref = reference_moving_avg(x, ker, stride)
        assert y.shape == y_ref.shape
        if not jnp.allclose(y, y_ref, rtol=1e-4, atol=1e-5):
            raise AssertionError(
                f"Pallas moving_avg mismatch (ker={ker}, stride={stride})"
            )

    print("KERNEL_OK")
</pallas_src>

<mosaic_0001>
module attributes {stable_mosaic.version = 11 : i64} {
  func.func @moving_avg_kernel(%arg0: memref<16x16xf32, #tpu.memory_space<vmem>>, %arg1: memref<16x8xf32, #tpu.memory_space<vmem>>, %arg2: memref<16x8xf32, #tpu.memory_space<vmem>>) attributes {dimension_semantics = [], scalar_prefetch = 0 : i64, scratch_operands = 0 : i64, tpu.core_type = #tpu.core_type<tc>} {
    %c0 = arith.constant 0 : index
    %c0_0 = arith.constant 0 : index
    %0 = vector.load %arg0[%c0, %c0_0] : memref<16x16xf32, #tpu.memory_space<vmem>>, vector<16x16xf32>
    %c0_1 = arith.constant 0 : index
    %c0_2 = arith.constant 0 : index
    %1 = vector.load %arg1[%c0_1, %c0_2] : memref<16x8xf32, #tpu.memory_space<vmem>>, vector<16x8xf32>
    %cst = arith.constant dense<0.000000e+00> : vector<16x8xf32>
    %2 = tpu.matmul %0, %1, %cst {dimension_numbers = #tpu.dot_dimension_numbers<[1], [0], [0], [1], [0, 0, 1, 1], [], []>} : vector<16x16xf32>, vector<16x8xf32>, vector<16x8xf32> -> vector<16x8xf32>
    %c0_3 = arith.constant 0 : index
    %c0_4 = arith.constant 0 : index
    %3 = vector.load %arg2[%c0_3, %c0_4] : memref<16x8xf32, #tpu.memory_space<vmem>>, vector<16x8xf32>
    tpu.vector_store %arg2[%c0_3, %c0_4], %2 {strides = array<i32>} : memref<16x8xf32, #tpu.memory_space<vmem>>, vector<16x8xf32>,
    return
  }
}

</mosaic_0001>

<bundles_post_ra>
// kernel: moving_avg_forward.1
= control target key start
LH: loop header
LB: loop body
LE: loop exit
PB: predicated region body
PF: predicated region fallthrough
CT: control target
= control target key end

     0   :  { %vm15_vm0 = vcmask 130048   ;;  %vm97_vm1 = vcmask 64512   ;;  %s150_s1 = inlined_call_operand.vmem [shape: f32[16,8], index: 1, kind: input, shape index: {}]   ;;  %s151_s0 = inlined_call_operand.vmem [shape: f32[16,16], index: 0, kind: input, shape index: {}]   ;;  %s152_s2 = inlined_call_operand.vmem [shape: f32[16,8], index: 2, kind: output, shape index: {}]  }
   0x1   :  { %v14_v0 = vld [vmem:[%s150_s1 + $0x8] sm:$0xff]  ;;  %v13_v1 = vld [vmem:[%s150_s1] sm:$0xff] }
   0x2   :  { %v11_v2 = vld [vmem:[%s151_s0] sm:$0xff]  ;;  %110 = vmatprep.subr.mxu0 %v14_v0  ;;  %v12_v3 = vld [vmem:[%s151_s0 + $0x8] sm:$0xff] }
   0x3   :  { %114 = vmatprep.mubr.msk.f32.mxu0 %vm15_vm0, %v11_v2  ;;  %111 = vmatpush3.msra.mxu0 %v14_v0 }
   0x4   :  { %112 = vmatprep.subr.mxu0 %v13_v1 }
   0x5   :  { %113 = vmatpush3.msra.mxu0 %v13_v1 }
   0x6   :  { %115 = vmatmul.mubr.msk.f32.vlgmr.msra.gmra.mxu0 %vm15_vm0, %v12_v3 }
  0xc6   :  { %v116_v4 = vpop.f32.mrf.mxu0 }
  0xc7   :  { %99 = vst.msk [vmem:[%s152_s2 + $0x8] sm:$0xff] %vm97_vm1, %v116_v4 }
  0xc8   :  { %v88_v5 = vpop.f32.mrf.mxu0 }
  0xc9   :  { %98 = vst.msk [vmem:[%s152_s2] sm:$0xff] %vm97_vm1, %v88_v5 }

</bundles_post_ra>
